<compile_context>
chip_gen: v7x
topology: tpu7x:2x2x1
jax: 0.10.0
libtpu: 0.0.40
codegen_flags: <defaults>
</compile_context>

<pallas_src>
import jax
import jax.numpy as jnp
from jax.experimental import pallas as pl
from jax.experimental.pallas import tpu as pltpu


def _pick_hw_tile(hw, c, bytes_per_elem, target_bytes=4 * 1024 * 1024):
    """Largest lane tile (multiple of 128) keeping one buffer ~<= target_bytes."""
    if hw * c * bytes_per_elem <= target_bytes:
        return hw                       # full spatial extent in one block
    tile = int(target_bytes // max(1, c * bytes_per_elem))
    tile = max(128, min(tile, hw))
    return (tile // 128) * 128


def _make_kernel(hw_total, hw_tile, needs_mask):
    inv_hw = 1.0 / float(hw_total)

    def kernel(x_ref, w1t_ref, b1_ref, w2t_ref, b2_ref, o_ref,
               sum_acc, max_acc):
        k = pl.program_id(1)

        @pl.when(k == 0)
        def _init():
            sum_acc[...] = jnp.zeros_like(sum_acc)
            max_acc[...] = jnp.full_like(max_acc, -jnp.inf)

        x = x_ref[...].astype(jnp.float32)                     # (C, hw_tile)

        if needs_mask:
            lane = jax.lax.broadcasted_iota(jnp.int32, x.shape, dimension=1)
            valid = (k * hw_tile + lane) < hw_total
            xs = jnp.where(valid, x, 0.0)
            xm = jnp.where(valid, x, -jnp.inf)
        else:
            xs = x
            xm = x

        # Partial spatial reductions (cross-lane -> XLU slot; HBM-bound overall).
        sum_acc[...] += jnp.sum(xs, axis=1, keepdims=True)     # (C, 1)
        max_acc[...] = jnp.maximum(max_acc[...],
                                   jnp.max(xm, axis=1, keepdims=True))

        @pl.when(k == pl.num_programs(1) - 1)
        def _finalize():
            avg = sum_acc[...] * inv_hw                        # (C, 1)
            mx = max_acc[...]                                  # (C, 1)

            # Shared MLP on both pooled vectors.  Second layer is linear, so
            # fc(avg)+fc(max) = W2 @ (h_avg + h_max) + 2*b2.
            h_avg = jnp.maximum(
                jnp.dot(w1t_ref[...], avg,
                        preferred_element_type=jnp.float32) + b1_ref[...], 0.0)
            h_max = jnp.maximum(
                jnp.dot(w1t_ref[...], mx,
                        preferred_element_type=jnp.float32) + b1_ref[...], 0.0)
            logits = jnp.dot(w2t_ref[...], h_avg + h_max,
                             preferred_element_type=jnp.float32) \
                     + 2.0 * b2_ref[...]                       # (C, 1)
            o_ref[...] = jax.nn.sigmoid(logits).astype(o_ref.dtype)

    return kernel


def channel_attention(x_nchw, w1, b1, w2, b2):
    """x_nchw: (B, C, H, W). w1: (C, Cr), b1: (Cr,), w2: (Cr, C), b2: (C,).
    Returns (B, C) float32 attention weights = sigmoid(fc(avg) + fc(max))."""
    B, C, H, W = x_nchw.shape
    HW = H * W
    Cr = w1.shape[1]

    # Free reshape (merges trailing contiguous dims; no data movement).
    x_bcs = x_nchw.reshape(B, C, HW)

    # Tiny parameter reshapes so the kernel works entirely in a
    # channels-on-sublanes layout (no in-kernel transposes).
    w1t = jnp.transpose(jnp.asarray(w1, jnp.float32))          # (Cr, C)
    b1c = jnp.asarray(b1, jnp.float32).reshape(Cr, 1)          # (Cr, 1)
    w2t = jnp.transpose(jnp.asarray(w2, jnp.float32))          # (C, Cr)
    b2c = jnp.asarray(b2, jnp.float32).reshape(C, 1)           # (C, 1)

    bytes_per_elem = jnp.dtype(x_nchw.dtype).itemsize
    hw_tile = _pick_hw_tile(HW, C, bytes_per_elem)
    num_k = pl.cdiv(HW, hw_tile)
    needs_mask = (HW % hw_tile) != 0

    kernel = _make_kernel(HW, hw_tile, needs_mask)

    grid_spec = pltpu.PrefetchScalarGridSpec(
        num_scalar_prefetch=0,
        grid=(B, num_k),
        in_specs=[
            # One batch element, full channels, one spatial chunk per step.
            pl.BlockSpec((None, C, hw_tile), lambda b, k: (b, 0, k)),
            # MLP params: constant index map -> resident in VMEM, DMA'd once.
            pl.BlockSpec((Cr, C), lambda b, k: (0, 0)),
            pl.BlockSpec((Cr, 1), lambda b, k: (0, 0)),
            pl.BlockSpec((C, Cr), lambda b, k: (0, 0)),
            pl.BlockSpec((C, 1), lambda b, k: (0, 0)),
        ],
        out_specs=pl.BlockSpec((None, C, 1), lambda b, k: (b, 0, 0)),
        scratch_shapes=[
            pltpu.VMEM((C, 1), jnp.float32),   # running sum
            pltpu.VMEM((C, 1), jnp.float32),   # running max
        ],
    )

    out = pl.pallas_call(
        kernel,
        out_shape=jax.ShapeDtypeStruct((B, C, 1), jnp.float32),
        grid_spec=grid_spec,
        compiler_params=pltpu.CompilerParams(
            dimension_semantics=("parallel", "arbitrary")),
    )(x_bcs, w1t, b1c, w2t, b2c)

    return out.reshape(B, C)


def reference(x_nchw, w1, b1, w2, b2):
    avg = jnp.mean(x_nchw, axis=(2, 3))                        # (B, C)
    mx = jnp.max(x_nchw, axis=(2, 3))                          # (B, C)

    def mlp(v):
        h = jnp.maximum(v @ w1 + b1, 0.0)
        return h @ w2 + b2

    return jax.nn.sigmoid(mlp(avg) + mlp(mx))


if __name__ == "__main__":
    B, C, H, W = 2, 32, 16, 16
    reduction_ratio = 16
    Cr = max(1, C // reduction_ratio)

    key = jax.random.PRNGKey(0)
    kx, kw1, kb1, kw2, kb2 = jax.random.split(key, 5)

    x = jax.random.normal(kx, (B, C, H, W), dtype=jnp.float32)

    # Deterministic parameters (x @ W + b convention; equivalent to PyTorch's
    # x @ weight.T + bias with weight = W.T).
    w1 = jax.random.normal(kw1, (C, Cr), dtype=jnp.float32) * 0.1
    b1 = jax.random.normal(kb1, (Cr,), dtype=jnp.float32) * 0.1
    w2 = jax.random.normal(kw2, (Cr, C), dtype=jnp.float32) * 0.1
    b2 = jax.random.normal(kb2, (C,), dtype=jnp.float32) * 0.1

    out = channel_attention(x, w1, b1, w2, b2)
    jax.block_until_ready(out)

    ref = reference(x, w1, b1, w2, b2)
    assert out.shape == (B, C)
    assert jnp.allclose(out, ref, atol=1e-5, rtol=1e-5), "mismatch vs reference"

    print("KERNEL_OK")
</pallas_src>

<mosaic_0001>
module attributes {stable_mosaic.version = 11 : i64} {
  func.func @kernel(%arg0: i32, %arg1: i32, %arg2: memref<1x32x256xf32, #tpu.memory_space<vmem>>, %arg3: memref<2x32xf32, #tpu.memory_space<vmem>>, %arg4: memref<2x1xf32, #tpu.memory_space<vmem>>, %arg5: memref<32x2xf32, #tpu.memory_space<vmem>>, %arg6: memref<32x1xf32, #tpu.memory_space<vmem>>, %arg7: memref<1x32x1xf32, #tpu.memory_space<vmem>>, %arg8: memref<32x1xf32, #tpu.memory_space<vmem>>, %arg9: memref<32x1xf32, #tpu.memory_space<vmem>>) attributes {dimension_semantics = [#tpu.dimension_semantics<parallel>, #tpu.dimension_semantics<arbitrary>], iteration_bounds = array<i64: 2, 1>, scalar_prefetch = 0 : i64, scratch_operands = 2 : i64, tpu.core_type = #tpu.core_type<tc>, window_params = [{transform_indices = @transform_0, window_bounds = array<i64: 1, 32, 256>}, {pipeline_mode = #tpu.pipeline_mode<synchronous>, transform_indices = @transform_1, window_bounds = array<i64: 2, 32>}, {pipeline_mode = #tpu.pipeline_mode<synchronous>, transform_indices = @transform_2, window_bounds = array<i64: 2, 1>}, {pipeline_mode = #tpu.pipeline_mode<synchronous>, transform_indices = @transform_3, window_bounds = array<i64: 32, 2>}, {pipeline_mode = #tpu.pipeline_mode<synchronous>, transform_indices = @transform_4, window_bounds = array<i64: 32, 1>}, {transform_indices = @transform_5, window_bounds = array<i64: 1, 32, 1>}]} {
    %c0_i32 = arith.constant 0 : i32
    %0 = arith.cmpi eq, %arg1, %c0_i32 : i32
    %1 = arith.extui %0 : i1 to i32
    %c0_i32_0 = arith.constant 0 : i32
    %2 = arith.cmpi ne, %1, %c0_i32_0 : i32
    scf.if %2 {
      %cst_14 = arith.constant 0.000000e+00 : f32
      %18 = vector.broadcast %cst_14 : f32 to vector<32x1xf32>
      %c0_15 = arith.constant 0 : index
      %c0_16 = arith.constant 0 : index
      %19 = vector.load %arg8[%c0_15, %c0_16] : memref<32x1xf32, #tpu.memory_space<vmem>>, vector<32x1xf32>
      tpu.vector_store %arg8[%c0_15, %c0_16], %18 {strides = array<i32>} : memref<32x1xf32, #tpu.memory_space<vmem>>, vector<32x1xf32>,
      %cst_17 = arith.constant 0xFF800000 : f32
      %20 = vector.broadcast %cst_17 : f32 to vector<32x1xf32>
      %c0_18 = arith.constant 0 : index
      %c0_19 = arith.constant 0 : index
      %21 = vector.load %arg9[%c0_18, %c0_19] : memref<32x1xf32, #tpu.memory_space<vmem>>, vector<32x1xf32>
      tpu.vector_store %arg9[%c0_18, %c0_19], %20 {strides = array<i32>} : memref<32x1xf32, #tpu.memory_space<vmem>>, vector<32x1xf32>,
    } else {
    }
    %c0 = arith.constant 0 : index
    %c0_1 = arith.constant 0 : index
    %c0_2 = arith.constant 0 : index
    %3 = vector.load %arg2[%c0, %c0_1, %c0_2] : memref<1x32x256xf32, #tpu.memory_space<vmem>>, vector<1x32x256xf32>
    %4 = vector.shape_cast %3 : vector<1x32x256xf32> to vector<32x256xf32>
    %c0_3 = arith.constant 0 : index
    %c0_4 = arith.constant 0 : index
    %5 = vector.load %arg8[%c0_3, %c0_4] : memref<32x1xf32, #tpu.memory_space<vmem>>, vector<32x1xf32>
    %cst = arith.constant dense<0.000000e+00> : vector<32xf32>
    %6 = vector.multi_reduction <add>, %4, %cst [1] : vector<32x256xf32> to vector<32xf32>
    %7 = vector.shape_cast %6 : vector<32xf32> to vector<32x1xf32>
    %8 = arith.addf %5, %7 : vector<32x1xf32>
    %c0_5 = arith.constant 0 : index
    %c0_6 = arith.constant 0 : index
    %9 = vector.load %arg8[%c0_5, %c0_6] : memref<32x1xf32, #tpu.memory_space<vmem>>, vector<32x1xf32>
    tpu.vector_store %arg8[%c0_5, %c0_6], %8 {strides = array<i32>} : memref<32x1xf32, #tpu.memory_space<vmem>>, vector<32x1xf32>,
    %c0_7 = arith.constant 0 : index
    %c0_8 = arith.constant 0 : index
    %10 = vector.load %arg9[%c0_7, %c0_8] : memref<32x1xf32, #tpu.memory_space<vmem>>, vector<32x1xf32>
    %cst_9 = arith.constant dense<0xFF800000> : vector<32xf32>
    %11 = vector.multi_reduction <maximumf>, %4, %cst_9 [1] : vector<32x256xf32> to vector<32xf32>
    %12 = vector.shape_cast %11 : vector<32xf32> to vector<32x1xf32>
    %13 = arith.maximumf %10, %12 : vector<32x1xf32>
    %c0_10 = arith.constant 0 : index
    %c0_11 = arith.constant 0 : index
    %14 = vector.load %arg9[%c0_10, %c0_11] : memref<32x1xf32, #tpu.memory_space<vmem>>, vector<32x1xf32>
    tpu.vector_store %arg9[%c0_10, %c0_11], %13 {strides = array<i32>} : memref<32x1xf32, #tpu.memory_space<vmem>>, vector<32x1xf32>,
    %c0_i32_12 = arith.constant 0 : i32
    %15 = arith.cmpi eq, %arg1, %c0_i32_12 : i32
    %16 = arith.extui %15 : i1 to i32
    %c0_i32_13 = arith.constant 0 : i32
    %17 = arith.cmpi ne, %16, %c0_i32_13 : i32
    scf.if %17 {
      %c0_14 = arith.constant 0 : index
      %c0_15 = arith.constant 0 : index
      %18 = vector.load %arg8[%c0_14, %c0_15] : memref<32x1xf32, #tpu.memory_space<vmem>>, vector<32x1xf32>
      %cst_16 = arith.constant 3.906250e-03 : f32
      %19 = vector.broadcast %cst_16 : f32 to vector<32x1xf32>
      %20 = arith.mulf %18, %19 : vector<32x1xf32>
      %c0_17 = arith.constant 0 : index
      %c0_18 = arith.constant 0 : index
      %21 = vector.load %arg9[%c0_17, %c0_18] : memref<32x1xf32, #tpu.memory_space<vmem>>, vector<32x1xf32>
      %c0_19 = arith.constant 0 : index
      %c0_20 = arith.constant 0 : index
      %22 = vector.load %arg3[%c0_19, %c0_20] : memref<2x32xf32, #tpu.memory_space<vmem>>, vector<2x32xf32>
      %cst_21 = arith.constant dense<0.000000e+00> : vector<2x1xf32>
      %23 = tpu.matmul %22, %20, %cst_21 {dimension_numbers = #tpu.dot_dimension_numbers<[1], [0], [0], [1], [0, 0, 1, 1], [], []>} : vector<2x32xf32>, vector<32x1xf32>, vector<2x1xf32> -> vector<2x1xf32>
      %c0_22 = arith.constant 0 : index
      %c0_23 = arith.constant 0 : index
      %24 = vector.load %arg4[%c0_22, %c0_23] : memref<2x1xf32, #tpu.memory_space<vmem>>, vector<2x1xf32>
      %25 = arith.addf %23, %24 : vector<2x1xf32>
      %cst_24 = arith.constant 0.000000e+00 : f32
      %26 = vector.broadcast %cst_24 : f32 to vector<2x1xf32>
      %27 = arith.maximumf %25, %26 : vector<2x1xf32>
      %c0_25 = arith.constant 0 : index
      %c0_26 = arith.constant 0 : index
      %28 = vector.load %arg3[%c0_25, %c0_26] : memref<2x32xf32, #tpu.memory_space<vmem>>, vector<2x32xf32>
      %cst_27 = arith.constant dense<0.000000e+00> : vector<2x1xf32>
      %29 = tpu.matmul %28, %21, %cst_27 {dimension_numbers = #tpu.dot_dimension_numbers<[1], [0], [0], [1], [0, 0, 1, 1], [], []>} : vector<2x32xf32>, vector<32x1xf32>, vector<2x1xf32> -> vector<2x1xf32>
      %c0_28 = arith.constant 0 : index
      %c0_29 = arith.constant 0 : index
      %30 = vector.load %arg4[%c0_28, %c0_29] : memref<2x1xf32, #tpu.memory_space<vmem>>, vector<2x1xf32>
      %31 = arith.addf %29, %30 : vector<2x1xf32>
      %cst_30 = arith.constant 0.000000e+00 : f32
      %32 = vector.broadcast %cst_30 : f32 to vector<2x1xf32>
      %33 = arith.maximumf %31, %32 : vector<2x1xf32>
      %c0_31 = arith.constant 0 : index
      %c0_32 = arith.constant 0 : index
      %34 = vector.load %arg5[%c0_31, %c0_32] : memref<32x2xf32, #tpu.memory_space<vmem>>, vector<32x2xf32>
      %35 = arith.addf %27, %33 : vector<2x1xf32>
      %cst_33 = arith.constant dense<0.000000e+00> : vector<32x1xf32>
      %36 = tpu.matmul %34, %35, %cst_33 {dimension_numbers = #tpu.dot_dimension_numbers<[1], [0], [0], [1], [0, 0, 1, 1], [], []>} : vector<32x2xf32>, vector<2x1xf32>, vector<32x1xf32> -> vector<32x1xf32>
      %c0_34 = arith.constant 0 : index
      %c0_35 = arith.constant 0 : index
      %37 = vector.load %arg6[%c0_34, %c0_35] : memref<32x1xf32, #tpu.memory_space<vmem>>, vector<32x1xf32>
      %cst_36 = arith.constant 2.000000e+00 : f32
      %38 = vector.broadcast %cst_36 : f32 to vector<32x1xf32>
      %39 = arith.mulf %38, %37 : vector<32x1xf32>
      %40 = arith.addf %36, %39 : vector<32x1xf32>
      %41 = arith.negf %40 : vector<32x1xf32>
      %42 = math.exp %41 : vector<32x1xf32>
      %cst_37 = arith.constant 1.000000e+00 : f32
      %43 = vector.broadcast %cst_37 : f32 to vector<32x1xf32>
      %44 = arith.addf %43, %42 : vector<32x1xf32>
      %45 = arith.divf %43, %44 : vector<32x1xf32>
      %c0_38 = arith.constant 0 : index
      %c0_39 = arith.constant 0 : index
      %c0_40 = arith.constant 0 : index
      %46 = vector.load %arg7[%c0_38, %c0_39, %c0_40] : memref<1x32x1xf32, #tpu.memory_space<vmem>>, vector<1x32x1xf32>
      %47 = vector.shape_cast %46 : vector<1x32x1xf32> to vector<32x1xf32>
      %48 = vector.shape_cast %45 : vector<32x1xf32> to vector<1x32x1xf32>
      tpu.vector_store %arg7[%c0_38, %c0_39, %c0_40], %48 {strides = array<i32>} : memref<1x32x1xf32, #tpu.memory_space<vmem>>, vector<1x32x1xf32>,
    } else {
    }
    return
  }
  func.func @transform_0(%arg0: i32, %arg1: i32) -> (i32, i32, i32) {
    %c0_i32 = arith.constant 0 : i32
    %c0_i32_0 = arith.constant 0 : i32
    return %arg0, %c0_i32, %arg1 : i32, i32, i32
  }
  func.func @transform_1(%arg0: i32, %arg1: i32) -> (i32, i32) {
    %c0_i32 = arith.constant 0 : i32
    %c0_i32_0 = arith.constant 0 : i32
    %c0_i32_1 = arith.constant 0 : i32
    return %c0_i32, %c0_i32_0 : i32, i32
  }
  func.func @transform_2(%arg0: i32, %arg1: i32) -> (i32, i32) {
    %c0_i32 = arith.constant 0 : i32
    %c0_i32_0 = arith.constant 0 : i32
    %c0_i32_1 = arith.constant 0 : i32
    return %c0_i32, %c0_i32_0 : i32, i32
  }
  func.func @transform_3(%arg0: i32, %arg1: i32) -> (i32, i32) {
    %c0_i32 = arith.constant 0 : i32
    %c0_i32_0 = arith.constant 0 : i32
    %c0_i32_1 = arith.constant 0 : i32
    return %c0_i32, %c0_i32_0 : i32, i32
  }
  func.func @transform_4(%arg0: i32, %arg1: i32) -> (i32, i32) {
    %c0_i32 = arith.constant 0 : i32
    %c0_i32_0 = arith.constant 0 : i32
    %c0_i32_1 = arith.constant 0 : i32
    return %c0_i32, %c0_i32_0 : i32, i32
  }
  func.func @transform_5(%arg0: i32, %arg1: i32) -> (i32, i32, i32) {
    %c0_i32 = arith.constant 0 : i32
    %c0_i32_0 = arith.constant 0 : i32
    %c0_i32_1 = arith.constant 0 : i32
    return %arg0, %c0_i32, %c0_i32_0 : i32, i32, i32
  }
}

</mosaic_0001>

<bundles_post_ra>
// kernel: tpu_custom_call.1
= control target key start
LH: loop header
LB: loop body
LE: loop exit
PB: predicated region body
PF: predicated region fallthrough
CT: control target
= control target key end

     0   :  { %10 = vsyncpa [#allocation5], 0  ;;  %s1175_s0 = inlined_call_operand.hbm [shape: f32[2,32,256], index: 0, kind: input, shape index: {}]   ;;  %s1176_s1 = inlined_call_operand.vmem [shape: f32[2,32], index: 1, kind: input, shape index: {}]   ;;  %s1177_s2 = inlined_call_operand.vmem [shape: f32[2,1], index: 2, kind: input, shape index: {}]   ;;  %s1178_s3 = inlined_call_operand.vmem [shape: f32[32,2], index: 3, kind: input, shape index: {}]   ;;  %s1179_s4 = inlined_call_operand.vmem [shape: f32[32,1], index: 4, kind: input, shape index: {}]   ;;  %s1180_s5 = inlined_call_operand.vmem [shape: f32[2,32,1], index: 5, kind: output, shape index: {}]  }
   0x1   :  { %12 = vsyncpa [#allocation5 + $0x1], 0  ;;  %s997_s18 = smov 0   ;;  %s999_s19 = smov 0  }
   0x2   :  { %s1001_s20 = smov 0   ;;  %s1003_s21 = smov 0  }
   0x3   :  { %s1005_s22 = smov 0   ;;  %s1007_s23 = smov 0  }
   0x4 LB: > { %s716_s24 = sadd.s32 4294967295, %s958_s23   ;;  %s30_s25 = sadd.s32 1, %s954_s22  ;;  %s958_s23 = sphi %s1007_s23, %s18_s23   ;;  %s954_s22 = sphi %s1005_s22, %s1188_s22   ;;  %s950_s21 = sphi %s1003_s21, %s1187_s21   ;;  %s946_s20 = sphi %s1001_s20, %s1186_s20   ;;  %s942_s19 = sphi %s999_s19, %s1185_s19   ;;  %s938_s18 = sphi %s997_s18, %s1184_s18  }
   0x5   : > { %p32_p0 = scmp.ge.s32.totalorder %s30_s25, 2  ;;  %s39_s26 = sadd.s32 1, %s946_s20 }
   0x6   : > { %p46_p1 = scmp.ne.s32.totalorder %s946_s20, %s942_s19  ;;  %p47_p2 = scmp.eq.s32.totalorder %s958_s23, 0 }
   0x7   : > { %s1190_s25 = smov (%p32_p0, %s30_s25), 0  ;;  %p52_p4 = scmp.ne.s32.totalorder %s942_s19, %s938_s18 }
   0x8   : > { %p1033_p3 = por %p47_p2, %p46_p1  ;;  %s34_s28 = ssub.s32 %s954_s22, %s1190_s25 }
   0x9   : > { %p53_p5 = scmp.eq.s32.totalorder %s716_s24, 0  ;;  %p37_p6 = scmp.eq.s32.totalorder %s34_s28, 0 }
   0xa   : > { %p807_p8 = scmp.lt.s32.totalorder %s958_s23, 2  ;;  %s198_s6 = sand.u32 1, %s946_s20  }
   0xb   : > { %p1040_p7 = por %p53_p5, %p52_p4  ;;  %s740_s7 = sshll.u32 %s954_s22, 10 }
   0xc   : > { %s1046_s30 = scalar_select %p37_p6, %s946_s20, %s39_s26  }
   0xd   : > { %s720_s8 = sshll.u32 %s198_s6, 6  ;;  %s1053_s11 = scalar_lea.hbm %s1175_s0, %s740_s7 }
   0xe   : > { %s202_s12 = scalar_lea.vmem [#allocation4], %s720_s8  ;;  %p1057_p9 = pnand %p807_p8, %p1033_p3 }
   0xf   : > { %s211_s13 = sshll.u32 %s202_s12, 4  ;;  %s1063_s15 = scalar_lea.sflag [#allocation5], %s198_s6  ;;  %s1061_s13 = int_to_ptr.vmem [resolvable:$true] %s211_s13 }
  0x10   : > { %s878_s16 = scalar_lea.hbm %s1053_s11, 1024  ;;  %p880_p11 = pneg %p1057_p9 }
  0x11   : > { %p879_p10 = scmp.ne.s32.totalorder %s1053_s11, %s878_s16  ;;  %s883_s24 = scalar_lea.hbm %s1175_s0, 2048 }
  0x12   : > { %p884_p0 = scmp.lt.u32.totalorder %s1053_s11, %s1175_s0  ;;  %p885_p1 = scmp.lt.u32.totalorder %s883_s24, %s878_s16 }
  0x13   : > { %p881_p12 = pnand %p880_p11, %p879_p10  ;;  %p887_p3 = scmp.lt.u32.totalorder %s878_s16, %s1053_s11 }
  0x14   : > { %p886_p2 = por %p885_p1, %p884_p0 }
  0x15   : > { %p882_p13 = pneg %p881_p12 }
  0x16   : > { %p888_p4 = por %p887_p3, %p886_p2 }
  0x18   : > { %p889_p5 = pnand %p888_p4, %p882_p13 }
  0x1a   : > { %892 = shalt.err (!%p889_p5)
}
  0x1b   : > { %s893_s28 = scalar_lea.vmem %s1061_s13, 1024  ;;  %s960_s6 = smov [#allocation4]  }
  0x1c   : > { %p894_p6 = scmp.ne.s32.totalorder %s1061_s13, %s893_s28  ;;  %s898_s7 = sshll.u32 %s960_s6, 4  ;;  %s899_s7 = int_to_ptr.vmem [resolvable:$false] %s898_s7 }
  0x1d   : > { %s900_s8 = scalar_lea.vmem %s899_s7, 2048  ;;  %p901_p12 = scmp.lt.s32.totalorder %s1061_s13, %s899_s7 }
  0x1e   : > { %p896_p8 = pnand %p894_p6, %p880_p11  ;;  %p902_p0 = scmp.lt.s32.totalorder %s900_s8, %s893_s28 }
  0x20   : > { %p897_p10 = pneg %p896_p8  ;;  %p903_p1 = por %p902_p0, %p901_p12 }
  0x22   : > { %p904_p2 = pnand %p903_p1, %p897_p10 }
  0x24   : > { %907 = shalt.err (!%p904_p2)
}
  0x25   : > { %s961_s9 = smov 256   ;;  %s962_s10 = smov 16  }
  0x26   : > { %806 = dma.hbm_to_vmem [thread:$0]  (!%p1057_p9), %s1053_s11, 1024, %s1061_s13, %s1063_s15, %s961_s9, %s961_s9, %s962_s10  }
  0x27   : > { %p723_p11 = scmp.ge.s32.totalorder %s958_s23, 1  ;;  %p219_p13 = scmp.lt.s32.totalorder %s958_s23, 3 }
  0x29   : > { %p220_p3 = pnand %p723_p11, %p219_p13 }
  0x2a   : > { %s225_s12 = sand.u32 (!%p220_p3), 1, %s942_s19  }
  0x2b   : > { %223 = sbr.rel (%p220_p3) target bundleno = 687 (0x2af), region = 40  ;;  %s724_s16 = sshll.u32 (!%p220_p3), %s225_s12, 6 }
  0x2c   : > { %s226_s17 = scalar_lea.sflag (!%p220_p3), [#allocation5], %s225_s12  ;;  %s229_s18 = scalar_lea.vmem (!%p220_p3), [#allocation4], %s724_s16 }
  0x32   : > { %933 = dma.done.wait (%p1040_p7), %s226_s17, 1024  }
  0x33   : > { %935 = vsyncadd (%p1040_p7), %s226_s17, 4294966272  ;;  %vm266_vm0 = vcmask 7168   ;;  %v963_v0 = vmov -inf   ;;  %v275_v1 = vld [vmem:[%s229_s18] sm:$0xff]  ;;  %v276_v2 = vld [vmem:[%s229_s18 + $0x8] sm:$0xff]  ;;  %v964_v15 = vmov 0.0  }
  0x34   : > { %271 = vst.msk [vmem:[#allocation3] sm:$0xff] %vm266_vm0, %v963_v0  ;;  %272 = vst.msk [vmem:[#allocation3 + $0x8] sm:$0xff] %vm266_vm0, %v963_v0  ;;  %v277_v3 = vld [vmem:[%s229_s18 + $0x10] sm:$0xff]  ;;  %v312_v4 = vmax.f32 %v275_v1, %v276_v2  ;;  %v287_v5 = vadd.f32 %v276_v2, %v275_v1  ;;  %v278_v6 = vld [vmem:[%s229_s18 + $0x18] sm:$0xff]  ;;  %v965_v18 = vmov 0.0|0.0   ;;  %vm966_vm1 = vmmov 0  }
  0x35   : > { %273 = vst.msk [vmem:[#allocation3 + $0x10] sm:$0xff] %vm266_vm0, %v963_v0  ;;  %274 = vst.msk [vmem:[#allocation3 + $0x18] sm:$0xff] %vm266_vm0, %v963_v0  ;;  %v315_v7 = vmax.f32 %v277_v3, %v278_v6  ;;  %v290_v8 = vadd.f32 %v278_v6, %v277_v3  ;;  %v281_v9 = vld [vmem:[%s229_s18 + $0x30] sm:$0xff]  ;;  %v282_v10 = vld [vmem:[%s229_s18 + $0x38] sm:$0xff]  ;;  %793 = vmatprep.subr.bf16.mxu1 %v965_v18  ;;  %787 = vmatprep.subr.bf16.mxu0 %v965_v18  ;;  %vm349_vm2 = vcmask 261120   ;;  %vm508_vm3 = vcmask 15360  }
  0x36   : > { %313 = vmax.xlane.f32.xlu1 %v312_v4  ;;  %288 = vadd.xlane.f32.xlu0 %v287_v5  ;;  %v279_v11 = vld [vmem:[%s229_s18 + $0x20] sm:$0xff]  ;;  %v280_v12 = vld [vmem:[%s229_s18 + $0x28] sm:$0xff]  ;;  %v296_v13 = vadd.f32 %v282_v10, %v281_v9  ;;  %267 = vst.msk [vmem:[#allocation2] sm:$0xff] %vm266_vm0, %v964_v15  ;;  %268 = vst.msk [vmem:[#allocation2 + $0x8] sm:$0xff] %vm266_vm0, %v964_v15  ;;  %v321_v16 = vmax.f32 %v281_v9, %v282_v10  ;;  %vm521_vm4 = vcmask 1041408   ;;  %p257_p7 = scmp.lt.s32.totalorder %s950_s21, 1 }
  0x37   : > { %v293_v14 = vadd.f32 %v280_v12, %v279_v11  ;;  %269 = vst.msk [vmem:[#allocation2 + $0x10] sm:$0xff] %vm266_vm0, %v964_v15  ;;  %270 = vst.msk [vmem:[#allocation2 + $0x18] sm:$0xff] %vm266_vm0, %v964_v15  ;;  %v318_v17 = vmax.f32 %v279_v11, %v280_v12  ;;  %765 = vmatprep.mubr.msk.f32.mxu0 %vm966_vm1, %v964_v15  ;;  %776 = vmatprep.mubr.msk.f32.mxu1 %vm966_vm1, %v964_v15  ;;  %v347_v59 = vld [vmem:[%s1176_s1] sm:$0x3]  ;;  %v497_v61 = vld [vmem:[%s1178_s3 + $0x10] sm:$0xff] }
  0x38   : > { %v495_v60 = vld [vmem:[%s1178_s3] sm:$0xff]  ;;  %v498_v9 = vld [vmem:[%s1178_s3 + $0x18] sm:$0xff]  ;;  %v501_v10 = vld [vmem:[%s1179_s4 + $0x8] sm:$0xff]  ;;  %s1192_s21 = smov (!%p257_p7, %s950_s21), 1 }
  0x39   : > { %v348_v62 = vld [vmem:[%s1177_s2] sm:$0x3]  ;;  %v503_v11 = vld [vmem:[%s1179_s4 + $0x18] sm:$0xff]  ;;  %s741_s13 = sshll.u32 %s1192_s21, 5 }
  0x3a   : > { %316 = vmax.xlane.f32.xlu1 %v315_v7  ;;  %291 = vadd.xlane.f32.xlu0 %v290_v8  ;;  %v496_v8 = vld [vmem:[%s1178_s3 + $0x8] sm:$0xff]  ;;  %v500_v12 = vld [vmem:[%s1179_s4] sm:$0xff]  ;;  %v507_v15 = vmul.f32 2.0, %v503_v11  ;;  %s261_s24 = scalar_lea.vmem %s1180_s5, %s741_s13 }
  0x3b   : > { %v308_v19 = vld [vmem:[#allocation3] sm:$0xff]  ;;  %v309_v25 = vld [vmem:[#allocation3 + $0x8] sm:$0xff] }
  0x3c   : > { %v311_v37 = vld [vmem:[#allocation3 + $0x18] sm:$0xff]  ;;  %v310_v38 = vld [vmem:[#allocation3 + $0x10] sm:$0xff] }
  0x3d   : > { %v283_v20 = vld [vmem:[#allocation2] sm:$0xff]  ;;  %v284_v26 = vld [vmem:[#allocation2 + $0x8] sm:$0xff] }
  0x3e   : > { %297 = vadd.xlane.f32.xlu1 %v296_v13  ;;  %294 = vadd.xlane.f32.xlu0 %v293_v14  ;;  %v286_v31 = vld [vmem:[#allocation2 + $0x18] sm:$0xff]  ;;  %v285_v32 = vld [vmem:[#allocation2 + $0x10] sm:$0xff]  ;;  %v505_v14 = vmul.f32 2.0, %v501_v10 }
  0x3f   : > { %v502_v13 = vld [vmem:[%s1179_s4 + $0x10] sm:$0xff] }
  0x42   : > { %322 = vmax.xlane.f32.xlu1 %v321_v16  ;;  %319 = vmax.xlane.f32.xlu0 %v318_v17  ;;  %v504_v16 = vmul.f32 2.0, %v500_v12  ;;  %v506_v17 = vmul.f32 2.0, %v502_v13 }
  0xc3   : > { %v314_v21 = vpop.xlane.xlu1 %313  ;;  %v289_v22 = vpop.xlane.xlu0 %288 }
  0xc4   : > { %v324_v23 = vmax.f32 %v308_v19, %v314_v21  ;;  %v299_v24 = vadd.f32 %v289_v22, %v283_v20 }
  0xc6   : > { %328 = vst.msk [vmem:[#allocation3] sm:$0xff] %vm266_vm0, %v324_v23  ;;  %304 = vst.msk [vmem:[#allocation2] sm:$0xff] %vm266_vm0, %v299_v24 }
  0xc7   : > { %v317_v27 = vpop.xlane.xlu1 %316  ;;  %v292_v28 = vpop.xlane.xlu0 %291 }
  0xc8   : > { %v325_v29 = vmax.f32 %v309_v25, %v317_v27  ;;  %v300_v30 = vadd.f32 %v292_v28, %v284_v26 }
  0xca   : > { %329 = vst.msk [vmem:[#allocation3 + $0x8] sm:$0xff] %vm266_vm0, %v325_v29  ;;  %305 = vst.msk [vmem:[#allocation2 + $0x8] sm:$0xff] %vm266_vm0, %v300_v30 }
  0xcb   : > { %v298_v33 = vpop.xlane.xlu1 %297  ;;  %v295_v34 = vpop.xlane.xlu0 %294 }
  0xcc   : > { %v302_v35 = vadd.f32 %v298_v33, %v286_v31  ;;  %v301_v36 = vadd.f32 %v295_v34, %v285_v32 }
  0xcd   : > { %v335_v41 = vld [vmem:[#allocation2] sm:$0xff] }
  0xce   : > { %307 = vst.msk [vmem:[#allocation2 + $0x18] sm:$0xff] %vm266_vm0, %v302_v35  ;;  %306 = vst.msk [vmem:[#allocation2 + $0x10] sm:$0xff] %vm266_vm0, %v301_v36  ;;  %v343_v44 = vld [vmem:[#allocation3] sm:$0xff]  ;;  %v339_v48 = vmul.f32 0.00390625, %v335_v41 }
  0xcf   : > { %v323_v39 = vpop.xlane.xlu1 %322  ;;  %v320_v40 = vpop.xlane.xlu0 %319 }
  0xd0   : > { %v327_v42 = vmax.f32 %v311_v37, %v323_v39  ;;  %v326_v43 = vmax.f32 %v310_v38, %v320_v40 }
  0xd1   : > { %v344_v45 = vld [vmem:[#allocation3 + $0x8] sm:$0xff] }
  0xd2   : > { %v336_v46 = vld [vmem:[#allocation2 + $0x8] sm:$0xff]  ;;  %331 = vst.msk [vmem:[#allocation3 + $0x18] sm:$0xff] %vm266_vm0, %v327_v42  ;;  %330 = vst.msk [vmem:[#allocation3 + $0x10] sm:$0xff] %vm266_vm0, %v326_v43  ;;  %v794_v47 = vpack.c.bf16 %v344_v45, %v343_v44 }
  0xd3   : > { %v340_v49 = vmul.f32 0.00390625, %v336_v46 }
  0xd4   : > { %795 = vmatpush3.bf16.msra.mxu1 %v794_v47 }
  0xd5   : > { %v788_v50 = vpack.c.bf16 %v340_v49, %v339_v48  ;;  %v337_v51 = vld [vmem:[#allocation2 + $0x10] sm:$0xff]  ;;  %v338_v52 = vld [vmem:[#allocation2 + $0x18] sm:$0xff]  ;;  %796 = vmatprep.subr.bf16.mxu1 %v965_v18 }
  0xd6   : > { %v341_v53 = vmul.f32 0.00390625, %v337_v51  ;;  %v342_v54 = vmul.f32 0.00390625, %v338_v52 }
  0xd7   : > { %789 = vmatpush3.bf16.msra.mxu0 %v788_v50 }
  0xd8   : > { %790 = vmatprep.subr.bf16.mxu0 %v965_v18  ;;  %v791_v55 = vpack.c.bf16 %v342_v54, %v341_v53 }
  0xd9   : > { %v345_v56 = vld [vmem:[#allocation3 + $0x10] sm:$0xff]  ;;  %v346_v57 = vld [vmem:[#allocation3 + $0x18] sm:$0xff] }
  0xda   : > { %v797_v58 = vpack.c.bf16 %v346_v57, %v345_v56 }
  0xdb   : > { %792 = vmatpush3.bf16.msra.mxu0 %v791_v55 }
  0xdc   : > { %798 = vmatpush3.bf16.msra.mxu1 %v797_v58 }
  0xde   : > { %766 = vmatmul.mubr.msk.f32.vlgmr.msra.gmra.mrb[0].mxu0 %vm349_vm2, %v347_v59 }
  0xdf   : > { %777 = vmatmul.mubr.msk.f32.vlgmr.msra.gmra.mrb[0].mxu1 %vm349_vm2, %v347_v59  ;;  %781 = vmatprep.mubr.msk.f32.mxu0 %vm508_vm3, %v495_v60 }
  0xe0   : > { %784 = vmatprep.mubr.msk.f32.mxu1 %vm508_vm3, %v497_v61 }
 0x1b1   : > { %v419_v63 = vpop.f32.mrb[0].mxu0 }
 0x1b2   : > { %v420_v0 = vadd.f32 %v419_v63, %v348_v62  ;;  %v767_v1 = vpop.f32.mrb[1].mxu0  ;;  %v490_v2 = vpop.f32.mrb[0].mxu1 }
 0x1b3   : > { %v491_v4 = vadd.f32 %v490_v2, %v348_v62  ;;  %v778_v5 = vpop.f32.mrb[1].mxu1 }
 0x1b4   : > { %v423_v3 = vmax.f32 %v420_v0, 0.0 }
 0x1b5   : > { %v494_v6 = vmax.f32 %v491_v4, 0.0 }
 0x1b7   : > { %v499_v7 = vadd.f32 %v494_v6, %v423_v3 }
 0x1b9   : > { %779 = vmatprep.subr.msk.mxu0 %vm521_vm4, %v499_v7  ;;  %799 = vmatprep.subr.msk.mxu1 %vm521_vm4, %v499_v7 }
 0x1ba   : > { %780 = vmatpush3.msk.msra.mxu0 %vm521_vm4, %v499_v7  ;;  %800 = vmatpush3.msk.msra.mxu1 %vm521_vm4, %v499_v7 }
 0x1bb   : > { %782 = vmatmul.mubr.msk.f32.vlgmr.msra.gmra.mrb[2].mxu0 %vm508_vm3, %v496_v8  ;;  %785 = vmatmul.mubr.msk.f32.vlgmr.msra.gmra.mrb[2].mxu1 %vm508_vm3, %v498_v9 }
 0x28e   : > { %v783_v18 = vpop.f32.mrb[2].mxu0  ;;  %v786_v19 = vpop.f32.mrb[2].mxu1 }
 0x28f   : > { %v597_v20 = vadd.f32 %v783_v18, %v505_v14  ;;  %v607_v21 = vadd.f32 %v786_v19, %v507_v15  ;;  %v591_v22 = vpop.f32.mrb[3].mxu0  ;;  %v601_v23 = vpop.f32.mrb[3].mxu1 }
 0x290   : > { %v592_v24 = vadd.f32 %v591_v22, %v504_v16  ;;  %v602_v25 = vadd.f32 %v601_v23, %v506_v17 }
 0x291   : > { %v735_v26 = vmul.f32 -1.442695, %v597_v20  ;;  %v737_v27 = vmul.f32 -1.442695, %v607_v21 }
 0x292   : > { %v734_v28 = vmul.f32 -1.442695, %v592_v24  ;;  %v736_v29 = vmul.f32 -1.442695, %v602_v25 }
 0x293   : > { %862 = vpow2.f32 %v735_v26 }
 0x294   : > { %864 = vpow2.f32 %v737_v27 }
 0x295   : > { %866 = vpow2.f32 %v734_v28 }
 0x296   : > { %868 = vpow2.f32 %v736_v29 }
 0x29d   : > { %v863_v30 = vpop.eup %862 }
 0x29e   : > { %v865_v31 = vpop.eup %864  ;;  %v623_v32 = vadd.f32 1.0, %v863_v30 }
 0x29f   : > { %v867_v33 = vpop.eup %866  ;;  %v625_v34 = vadd.f32 1.0, %v865_v31 }
 0x2a0   : > { %v869_v35 = vpop.eup %868  ;;  %870 = vrcp.f32 %v623_v32  ;;  %v622_v36 = vadd.f32 1.0, %v867_v33 }
 0x2a1   : > { %872 = vrcp.f32 %v625_v34  ;;  %v624_v37 = vadd.f32 1.0, %v869_v35 }
 0x2a2   : > { %874 = vrcp.f32 %v622_v36 }
 0x2a3   : > { %876 = vrcp.f32 %v624_v37 }
 0x2aa   : > { %v871_v38 = vpop.eup %870 }
 0x2ab   : > { %v873_v39 = vpop.eup %872  ;;  %635 = vst.msk [vmem:[%s261_s24 + $0x8] sm:$0xff] %vm266_vm0, %v871_v38 }
 0x2ac   : > { %v875_v40 = vpop.eup %874  ;;  %637 = vst.msk [vmem:[%s261_s24 + $0x18] sm:$0xff] %vm266_vm0, %v873_v39 }
 0x2ad   : > { %v877_v41 = vpop.eup %876  ;;  %634 = vst.msk [vmem:[%s261_s24] sm:$0xff] %vm266_vm0, %v875_v40 }
 0x2ae   : > { %636 = vst.msk [vmem:[%s261_s24 + $0x10] sm:$0xff] %vm266_vm0, %v877_v41 }
 0x2af PF: > { %s18_s23 = sadd.s32 1, %s958_s23   ;;  %s1184_s18 = smov %s942_s19 }
 0x2b0   : > { %p15_p9 = scmp.ge.s32.totalorder %s18_s23, 4   ;;  %s1185_s19 = smov %s946_s20 }
 0x2b1   : > { %s1186_s20 = smov %s1046_s30  ;;  %s1187_s21 = smov %s954_s22 }
 0x2b2   : > { %s1188_s22 = smov %s1190_s25  ;;  %17 = sbr.rel (!%p15_p9) target bundleno = 4 (0x4), region = 88 }
 0x2b9   :  { %659 = vsyncpa [#allocation5], 1 }
 0x2ba   :  { %661 = vsyncpa [#allocation5 + $0x1], 1 }

</bundles_post_ra>
